<compile_context>
chip_gen: v6e
topology: v6e:2x2x1
jax: 0.10.0
libtpu: 0.0.40
codegen_flags: <defaults>
</compile_context>

<pallas_src>
import functools
import math

import jax
import jax.numpy as jnp
from jax import lax
from jax.experimental import pallas as pl
from jax.experimental.pallas import tpu as pltpu


def _round_up(a, m):
    return (a + m - 1) // m * m


# --------------------------------------------------------------------------
# Generic "x @ w + b" kernel used for both im2col'd convolutions.
# bf16 operands, f32 accumulation, bias added in f32, cast to out dtype.
# One grid step = a block of `bm` output rows (many frames at once).
# --------------------------------------------------------------------------
def _matmul_bias_kernel(x_ref, w_ref, b_ref, o_ref):
    # x_ref: (bm, K) bf16; w_ref: (K, N) bf16; b_ref: (1, N) f32; o_ref: (bm, N)
    acc = jnp.dot(x_ref[...], w_ref[...], preferred_element_type=jnp.float32)
    o_ref[...] = (acc + b_ref[...]).astype(o_ref.dtype)


def matmul_bias(x, w, b, *, out_dtype=jnp.float32, block_rows=1024):
    """y = x @ w + b ;  x: (M, K) bf16,  w: (K, N) bf16,  b: (N,) f32."""
    M, K = x.shape
    N = w.shape[1]
    bm = min(block_rows, _round_up(M, 16))
    Mp = _round_up(M, bm)
    if Mp != M:
        x = jnp.pad(x, ((0, Mp - M), (0, 0)))
    out = pl.pallas_call(
        _matmul_bias_kernel,
        out_shape=jax.ShapeDtypeStruct((Mp, N), out_dtype),
        grid_spec=pltpu.PrefetchScalarGridSpec(
            num_scalar_prefetch=0,
            grid=(Mp // bm,),
            in_specs=[
                pl.BlockSpec((bm, K), lambda i: (i, 0)),
                pl.BlockSpec((K, N), lambda i: (0, 0)),
                pl.BlockSpec((1, N), lambda i: (0, 0)),
            ],
            out_specs=pl.BlockSpec((bm, N), lambda i: (i, 0)),
        ),
        compiler_params=pltpu.CompilerParams(
            dimension_semantics=("parallel",)),
    )(x, w, b.reshape(1, N))
    return out[:M] if Mp != M else out


# --------------------------------------------------------------------------
# im2col for 3x3, stride 1, pad 1 convolutions (built once per activation).
# --------------------------------------------------------------------------
def im2col_3x3(x_nhwc):
    """x_nhwc: (N, H, W, Cin) -> (N*H*W, 9*Cin) patches (tap-major, cin-minor)."""
    N, H, W, Cin = x_nhwc.shape
    xp = jnp.pad(x_nhwc, ((0, 0), (1, 1), (1, 1), (0, 0)))
    taps = [xp[:, dh:dh + H, dw:dw + W, :]
            for dh in range(3) for dw in range(3)]
    patches = jnp.stack(taps, axis=3)               # (N, H, W, 9, Cin)
    return patches.reshape(N * H * W, 9 * Cin)


def pack_conv_weight(w_oihw):
    """(Cout, Cin, 3, 3) torch layout -> (9*Cin, Cout), tap-major / cin-minor."""
    Cout, Cin = w_oihw.shape[:2]
    return jnp.transpose(w_oihw, (2, 3, 1, 0)).reshape(9 * Cin, Cout)


# --------------------------------------------------------------------------
# Multi-head attention over the T axis.  One grid step = one batch element,
# all heads batched inside the block (avoids paying per-step overhead nh times).
# --------------------------------------------------------------------------
def _attn_kernel(q_ref, k_ref, v_ref, o_ref, *, is_causal):
    # q/k/v_ref, o_ref: (1, nh, T, D) bf16
    _, nh, T, D = q_ref.shape
    scale = 1.0 / math.sqrt(D)
    q = q_ref[0]
    k = k_ref[0]
    v = v_ref[0]
    att = jnp.einsum("htd,hsd->hts", q, k,
                     preferred_element_type=jnp.float32) * scale
    if is_causal:
        row = lax.broadcasted_iota(jnp.int32, (T, T), 0)
        col = lax.broadcasted_iota(jnp.int32, (T, T), 1)
        att = jnp.where((col <= row)[None, :, :], att, -jnp.inf)
    att = att - jnp.max(att, axis=-1, keepdims=True)
    p = jnp.exp(att)                                # softmax math stays f32
    p = p * pl.reciprocal(jnp.sum(p, axis=-1, keepdims=True), approx=True)
    # TODO(synk): attn_drop (p=0.1) skipped -> eval-mode identity.
    y = jnp.einsum("hts,hsd->htd", p.astype(v.dtype), v,
                   preferred_element_type=jnp.float32)
    o_ref[0] = y.astype(o_ref.dtype)


def mha_over_time(q, k, v, *, is_causal=False):
    """q, k, v: [B, nh, T, D] bf16 -> [B, nh, T, D] bf16."""
    B, nh, T, D = q.shape
    spec = pl.BlockSpec((1, nh, T, D), lambda b: (b, 0, 0, 0))
    kernel = functools.partial(_attn_kernel, is_causal=is_causal)
    return pl.pallas_call(
        kernel,
        out_shape=jax.ShapeDtypeStruct((B, nh, T, D), jnp.bfloat16),
        grid_spec=pltpu.PrefetchScalarGridSpec(
            num_scalar_prefetch=0,
            grid=(B,),
            in_specs=[spec, spec, spec],
            out_specs=spec,
        ),
        compiler_params=pltpu.CompilerParams(
            dimension_semantics=("parallel",)),
    )(q, k, v)


# --------------------------------------------------------------------------
# Module wrapper (parameter setup + layout glue in plain JAX).
# --------------------------------------------------------------------------
class CnnSelfAttentionPallas:
    def __init__(self, H, W, C=1, T=32, output_channels=16, is_causal=False,
                 n_head=8, key=None):
        assert output_channels % n_head == 0
        self.C, self.T, self.O, self.nh = C, T, output_channels, n_head
        self.is_causal = is_causal
        if key is None:
            key = jax.random.PRNGKey(0)
        keys = jax.random.split(key, 8)

        def conv_params(kw, kb, cin, cout):
            # Deterministic init mimicking nn.Conv2d default bounds.
            fan_in = cin * 9
            bound = 1.0 / math.sqrt(fan_in)
            w = jax.random.uniform(kw, (cout, cin, 3, 3), jnp.float32,
                                   -bound, bound)
            b = jax.random.uniform(kb, (cout,), jnp.float32, -bound, bound)
            return w, b

        self.wk, self.bk = conv_params(keys[0], keys[1], C, output_channels)
        self.wq, self.bq = conv_params(keys[2], keys[3], C, output_channels)
        self.wv, self.bv = conv_params(keys[4], keys[5], C, output_channels)
        self.wo, self.bo = conv_params(keys[6], keys[7], output_channels,
                                       output_channels)

        # Fused QKV weights: channel layout [q | k | v]; within each block the
        # output channel index is head*hc + c, exactly like the torch convs.
        # Packed matmul weights live in bf16 (MXU operands); biases stay f32.
        self.w_qkv = jnp.concatenate(
            [pack_conv_weight(self.wq), pack_conv_weight(self.wk),
             pack_conv_weight(self.wv)], axis=1).astype(jnp.bfloat16)  # (9C,3O)
        self.b_qkv = jnp.concatenate([self.bq, self.bk, self.bv])       # f32
        self.w_out = pack_conv_weight(self.wo).astype(jnp.bfloat16)     # (9O,O)
        self.b_out = self.bo                                            # f32

    def __call__(self, x):
        # x: [B, T, C, H, W]  (same axis convention as the PyTorch module)
        B, T, C, H, W = x.shape
        nh, O = self.nh, self.O
        hc = O // nh
        HW = H * W                 # stride=1, pad=1, k=3 => H'=H, W'=W
        D = hc * HW

        # ---- fused q/k/v 3x3 conv as a single im2col matmul ---------------
        x_bf = x.astype(jnp.bfloat16)
        x_nhwc = jnp.transpose(x_bf, (0, 1, 3, 4, 2)).reshape(B * T, H, W, C)
        patches = im2col_3x3(x_nhwc)                          # (B*T*HW, 9C) bf16
        qkv = matmul_bias(patches, self.w_qkv, self.b_qkv,
                          out_dtype=jnp.bfloat16)             # (B*T*HW, 3O) bf16

        # ---- head gather: one fused XLA transpose pass ---------------------
        qkv = qkv.reshape(B, T, HW, 3, nh, hc)
        qkv = jnp.transpose(qkv, (3, 0, 4, 1, 5, 2)).reshape(3, B, nh, T, D)
        q, k, v = qkv[0], qkv[1], qkv[2]

        # ---- multi-head attention over T (all heads per grid step) --------
        y = mha_over_time(q, k, v, is_causal=self.is_causal)  # (B,nh,T,D) bf16
        # TODO(synk): resid_drop (p=0.1) skipped -> eval-mode identity.

        # ---- head scatter back to NHWC frames -------------------------------
        y = jnp.transpose(y.reshape(B, nh, T, hc, HW), (0, 2, 1, 3, 4))
        y_nhwc = jnp.transpose(y.reshape(B * T, O, HW),
                               (0, 2, 1)).reshape(B * T, H, W, O)

        # ---- output 3x3 conv as a single im2col matmul ----------------------
        patches_o = im2col_3x3(y_nhwc)                        # (B*T*HW, 9O) bf16
        out = matmul_bias(patches_o, self.w_out, self.b_out,
                          out_dtype=jnp.float32)              # (B*T*HW, O) f32
        out = out.reshape(B, T, H, W, O)
        return jnp.transpose(out, (0, 1, 4, 2, 3))            # (B, T, O, H, W)


# --------------------------------------------------------------------------
# Pure-JAX reference (for correctness check).
# --------------------------------------------------------------------------
def ref_forward(mod, x, *, is_causal=None):
    if is_causal is None:
        is_causal = mod.is_causal
    B, T, C, H, W = x.shape
    nh, O = mod.nh, mod.O
    hc = O // nh

    def conv(xi, w, b):
        y = lax.conv_general_dilated(
            xi, w, (1, 1), ((1, 1), (1, 1)),
            dimension_numbers=("NCHW", "OIHW", "NCHW"),
            precision=lax.Precision.HIGHEST)
        return y + b[None, :, None, None]

    xx = x.reshape(B * T, C, H, W)

    def proj(w, b):
        y = conv(xx, w, b).reshape(B, T, nh, hc, H, W)
        return jnp.transpose(y, (0, 2, 1, 3, 4, 5)).reshape(B, nh, T,
                                                            hc * H * W)

    k = proj(mod.wk, mod.bk)
    q = proj(mod.wq, mod.bq)
    v = proj(mod.wv, mod.bv)
    att = jnp.einsum("bhtd,bhsd->bhts", q, k,
                     precision=lax.Precision.HIGHEST) / math.sqrt(hc * H * W)
    if is_causal:
        mask = jnp.tril(jnp.ones((T, T), bool))
        att = jnp.where(mask[None, None], att, -jnp.inf)
    att = jax.nn.softmax(att, axis=-1)
    y = jnp.einsum("bhts,bhsd->bhtd", att, v,
                   precision=lax.Precision.HIGHEST)
    y = jnp.transpose(y.reshape(B, nh, T, hc, H, W),
                      (0, 2, 1, 3, 4, 5)).reshape(B * T, O, H, W)
    out = conv(y, mod.wo, mod.bo)
    return out.reshape(B, T, O, H, W)


if __name__ == "__main__":
    root = jax.random.PRNGKey(0)
    k_in, k_par = jax.random.split(root)

    B, T, C, H, W = 2, 8, 4, 8, 8
    O, nh = 16, 8          # head dim D = (O // nh) * H * W = 2 * 64 = 128

    x = jax.random.normal(k_in, (B, T, C, H, W), jnp.float32)

    # Non-causal module.
    mod = CnnSelfAttentionPallas(H, W, C=C, T=T, output_channels=O,
                                 is_causal=False, n_head=nh, key=k_par)
    out = jax.block_until_ready(mod(x))
    ref = ref_forward(mod, x)
    assert out.shape == (B, T, O, H, W)
    err = float(jnp.max(jnp.abs(out - ref)))
    # bf16-operand MXU matmuls (f32 accumulation) vs f32 HIGHEST reference.
    assert jnp.allclose(out, ref, atol=5e-2, rtol=5e-2), err

    # Causal variant (same weights / same key).
    mod_c = CnnSelfAttentionPallas(H, W, C=C, T=T, output_channels=O,
                                   is_causal=True, n_head=nh, key=k_par)
    out_c = jax.block_until_ready(mod_c(x))
    ref_c = ref_forward(mod_c, x)
    err_c = float(jnp.max(jnp.abs(out_c - ref_c)))
    assert jnp.allclose(out_c, ref_c, atol=5e-2, rtol=5e-2), err_c

    print("KERNEL_OK")
</pallas_src>

<mosaic_0001>
module attributes {stable_mosaic.version = 11 : i64} {
  func.func @_matmul_bias_kernel(%arg0: i32, %arg1: memref<1024x36xbf16, #tpu.memory_space<vmem>>, %arg2: memref<36x48xbf16, #tpu.memory_space<vmem>>, %arg3: memref<1x48xf32, #tpu.memory_space<vmem>>, %arg4: memref<1024x48xbf16, #tpu.memory_space<vmem>>) attributes {dimension_semantics = [#tpu.dimension_semantics<parallel>], iteration_bounds = array<i64: 1>, scalar_prefetch = 0 : i64, scratch_operands = 0 : i64, tpu.core_type = #tpu.core_type<tc>, window_params = [{transform_indices = @transform_0, window_bounds = array<i64: 1024, 36>}, {pipeline_mode = #tpu.pipeline_mode<synchronous>, transform_indices = @transform_1, window_bounds = array<i64: 36, 48>}, {pipeline_mode = #tpu.pipeline_mode<synchronous>, transform_indices = @transform_2, window_bounds = array<i64: 1, 48>}, {transform_indices = @transform_3, window_bounds = array<i64: 1024, 48>}]} {
    %c0 = arith.constant 0 : index
    %c0_0 = arith.constant 0 : index
    %0 = vector.load %arg1[%c0, %c0_0] : memref<1024x36xbf16, #tpu.memory_space<vmem>>, vector<1024x36xbf16>
    %c0_1 = arith.constant 0 : index
    %c0_2 = arith.constant 0 : index
    %1 = vector.load %arg2[%c0_1, %c0_2] : memref<36x48xbf16, #tpu.memory_space<vmem>>, vector<36x48xbf16>
    %cst = arith.constant dense<0.000000e+00> : vector<1024x48xf32>
    %2 = tpu.matmul %0, %1, %cst {dimension_numbers = #tpu.dot_dimension_numbers<[1], [0], [0], [1], [0, 0, 1, 1], [], []>} : vector<1024x36xbf16>, vector<36x48xbf16>, vector<1024x48xf32> -> vector<1024x48xf32>
    %c0_3 = arith.constant 0 : index
    %c0_4 = arith.constant 0 : index
    %3 = vector.load %arg3[%c0_3, %c0_4] : memref<1x48xf32, #tpu.memory_space<vmem>>, vector<1x48xf32>
    %4 = vector.broadcast %3 : vector<1x48xf32> to vector<1024x48xf32>
    %5 = arith.addf %2, %4 : vector<1024x48xf32>
    %6 = arith.truncf %5 : vector<1024x48xf32> to vector<1024x48xbf16>
    %c0_5 = arith.constant 0 : index
    %c0_6 = arith.constant 0 : index
    %7 = vector.load %arg4[%c0_5, %c0_6] : memref<1024x48xbf16, #tpu.memory_space<vmem>>, vector<1024x48xbf16>
    tpu.vector_store %arg4[%c0_5, %c0_6], %6 {strides = array<i32>} : memref<1024x48xbf16, #tpu.memory_space<vmem>>, vector<1024x48xbf16>,
    return
  }
  func.func @transform_0(%arg0: i32) -> (i32, i32) {
    %c0_i32 = arith.constant 0 : i32
    %c0_i32_0 = arith.constant 0 : i32
    return %arg0, %c0_i32 : i32, i32
  }
  func.func @transform_1(%arg0: i32) -> (i32, i32) {
    %c0_i32 = arith.constant 0 : i32
    %c0_i32_0 = arith.constant 0 : i32
    %c0_i32_1 = arith.constant 0 : i32
    return %c0_i32, %c0_i32_0 : i32, i32
  }
  func.func @transform_2(%arg0: i32) -> (i32, i32) {
    %c0_i32 = arith.constant 0 : i32
    %c0_i32_0 = arith.constant 0 : i32
    %c0_i32_1 = arith.constant 0 : i32
    return %c0_i32, %c0_i32_0 : i32, i32
  }
  func.func @transform_3(%arg0: i32) -> (i32, i32) {
    %c0_i32 = arith.constant 0 : i32
    %c0_i32_0 = arith.constant 0 : i32
    return %arg0, %c0_i32 : i32, i32
  }
}

</mosaic_0001>

<bundles_post_ra>
// kernel: tpu_custom_call.1
= control target key start
LH: loop header
LB: loop body
LE: loop exit
PB: predicated region body
PF: predicated region fallthrough
CT: control target
= control target key end

     0   :  { %vm683_vm0 = vcmask 1041408   ;;  %vm490_vm1 = vcmask 293888   ;;  %vm1744_vm2 = vcmask 388096   ;;  %s3471_s1 = inlined_call_operand.vmem [shape: bf16[36,48], index: 1, kind: input, shape index: {}]   ;;  %s3472_s0 = inlined_call_operand.vmem [shape: bf16[1024,36], index: 0, kind: input, shape index: {}]   ;;  %s3473_s2 = inlined_call_operand.vmem [shape: f32[1,48], index: 2, kind: input, shape index: {}]   ;;  %s3474_s3 = inlined_call_operand.vmem [shape: bf16[1024,48], index: 3, kind: output, shape index: {}]  }
   0x1   :  { %v2474_v0 = vld [vmem:[%s3471_s1 + $0x10] ss:$0 sps:$4 sm:$0x33]   ;;  %v2475_v1 = vld [vmem:[%s3471_s1 + $0x8] sm:$0xff]   ;;  %v2476_v3 = vld [vmem:[%s3471_s1] sm:$0xff]  }
   0x2   :  { %2472 = vmatprep.subr.msk.bf16.mxu0 %vm683_vm0, %v2474_v0  ;;  %2473 = vmatprep.subr.msk.bf16.mxu1 %vm683_vm0, %v2474_v0  ;;  %v685_v2 = vsel %vm683_vm0, %v2474_v0, 0  ;;  %v2477_v4 = vld [vmem:[%s3472_s0] sm:$0xff]   ;;  %v2479_v6 = vld [vmem:[%s3472_s0 + $0x8] sm:$0xff]   ;;  %v2481_v8 = vld [vmem:[%s3472_s0 + $0x10] sm:$0xff]  }
   0x3   :  { %2333 = vmatpush3.bf16.msra.mxu0 %v685_v2  ;;  %2469 = vmatpush3.bf16.msra.mxu1 %v685_v2  ;;  %v2478_v5 = vld [vmem:[%s3472_s0 + $0x100] sm:$0xff]   ;;  %v2480_v7 = vld [vmem:[%s3472_s0 + $0x108] sm:$0xff]   ;;  %v2482_v9 = vld [vmem:[%s3472_s0 + $0x110] sm:$0xff]  }
   0x4   :  { %2334 = vmatprep.subr.bf16.mxu0 %v2475_v1  ;;  %2467 = vmatprep.subr.bf16.mxu1 %v2475_v1  ;;  %v2483_v10 = vld [vmem:[%s3472_s0 + $0x18] sm:$0xff]   ;;  %v2485_v12 = vld [vmem:[%s3472_s0 + $0x20] sm:$0xff]   ;;  %v2487_v14 = vld [vmem:[%s3472_s0 + $0x28] sm:$0xff]  }
   0x5   :  { %2338 = vmatprep.mubr.msk.bf16.mxu0 %vm490_vm1, %v2477_v4  ;;  %2402 = vmatprep.mubr.msk.bf16.mxu1 %vm490_vm1, %v2478_v5  ;;  %v2484_v11 = vld [vmem:[%s3472_s0 + $0x118] sm:$0xff]   ;;  %v2486_v13 = vld [vmem:[%s3472_s0 + $0x120] sm:$0xff]   ;;  %v2488_v15 = vld [vmem:[%s3472_s0 + $0x128] sm:$0xff]  }
   0x6   :  { %v2489_v16 = vld [vmem:[%s3472_s0 + $0x30] sm:$0xff]   ;;  %v2491_v18 = vld [vmem:[%s3472_s0 + $0x38] sm:$0xff]   ;;  %v2493_v20 = vld [vmem:[%s3472_s0 + $0x40] sm:$0xff]  }
   0x7   :  { %2335 = vmatpush3.bf16.msra.mxu0 %v2475_v1  ;;  %2470 = vmatpush3.bf16.msra.mxu1 %v2475_v1  ;;  %v2490_v17 = vld [vmem:[%s3472_s0 + $0x130] sm:$0xff]   ;;  %v2492_v19 = vld [vmem:[%s3472_s0 + $0x138] sm:$0xff]   ;;  %v2494_v21 = vld [vmem:[%s3472_s0 + $0x140] sm:$0xff]  }
   0x8   :  { %2336 = vmatprep.subr.bf16.mxu0 %v2476_v3  ;;  %2468 = vmatprep.subr.bf16.mxu1 %v2476_v3  ;;  %v2495_v22 = vld [vmem:[%s3472_s0 + $0x48] sm:$0xff]   ;;  %v2497_v24 = vld [vmem:[%s3472_s0 + $0x50] sm:$0xff]   ;;  %v2499_v26 = vld [vmem:[%s3472_s0 + $0x58] sm:$0xff]  }
   0x9   :  { %v2496_v23 = vld [vmem:[%s3472_s0 + $0x148] sm:$0xff]   ;;  %v2498_v25 = vld [vmem:[%s3472_s0 + $0x150] sm:$0xff]   ;;  %v2500_v27 = vld [vmem:[%s3472_s0 + $0x158] sm:$0xff]  }
   0xa   :  { %v2501_v28 = vld [vmem:[%s3472_s0 + $0x60] sm:$0xff]   ;;  %v2503_v30 = vld [vmem:[%s3472_s0 + $0x68] sm:$0xff]   ;;  %v2505_v32 = vld [vmem:[%s3472_s0 + $0x70] sm:$0xff]  }
   0xb   :  { %2337 = vmatpush3.bf16.msra.mxu0 %v2476_v3  ;;  %2471 = vmatpush3.bf16.msra.mxu1 %v2476_v3  ;;  %v2502_v29 = vld [vmem:[%s3472_s0 + $0x160] sm:$0xff]   ;;  %v2504_v31 = vld [vmem:[%s3472_s0 + $0x168] sm:$0xff]   ;;  %v2506_v33 = vld [vmem:[%s3472_s0 + $0x170] sm:$0xff]  }
   0xc   :  { %v2507_v34 = vld [vmem:[%s3472_s0 + $0x78] sm:$0xff]   ;;  %v2509_v36 = vld [vmem:[%s3472_s0 + $0x80] sm:$0xff]   ;;  %v2511_v38 = vld [vmem:[%s3472_s0 + $0x88] sm:$0xff]  }
   0xd   :  { %v2508_v35 = vld [vmem:[%s3472_s0 + $0x178] sm:$0xff]   ;;  %v2510_v37 = vld [vmem:[%s3472_s0 + $0x180] sm:$0xff]   ;;  %v2512_v39 = vld [vmem:[%s3472_s0 + $0x188] sm:$0xff]  }
   0xe   :  { %2339 = vmatmul.mubr.msk.bf16.vlgmr.msra.gmra.mxu0 %vm490_vm1, %v2479_v6  ;;  %2403 = vmatmul.mubr.msk.bf16.vlgmr.msra.gmra.mxu1 %vm490_vm1, %v2480_v7  ;;  %v2513_v40 = vld [vmem:[%s3472_s0 + $0x90] sm:$0xff]   ;;  %v2515_v42 = vld [vmem:[%s3472_s0 + $0x98] sm:$0xff]   ;;  %v2517_v44 = vld [vmem:[%s3472_s0 + $0xa0] sm:$0xff]  }
   0xf   :  { %2342 = vmatprep.mubr.msk.bf16.mxu0 %vm490_vm1, %v2481_v8  ;;  %2406 = vmatprep.mubr.msk.bf16.mxu1 %vm490_vm1, %v2482_v9  ;;  %v2514_v41 = vld [vmem:[%s3472_s0 + $0x190] sm:$0xff]   ;;  %v2516_v43 = vld [vmem:[%s3472_s0 + $0x198] sm:$0xff]   ;;  %v2518_v45 = vld [vmem:[%s3472_s0 + $0x1a0] sm:$0xff]  }
  0x10   :  { %v2519_v46 = vld [vmem:[%s3472_s0 + $0xa8] sm:$0xff]   ;;  %v2521_v48 = vld [vmem:[%s3472_s0 + $0xb0] sm:$0xff]   ;;  %v2523_v50 = vld [vmem:[%s3472_s0 + $0xb8] sm:$0xff]  }
  0x11   :  { %v2520_v47 = vld [vmem:[%s3472_s0 + $0x1a8] sm:$0xff]   ;;  %v2522_v49 = vld [vmem:[%s3472_s0 + $0x1b0] sm:$0xff]   ;;  %v2524_v51 = vld [vmem:[%s3472_s0 + $0x1b8] sm:$0xff]  }
  0x12   :  { %v2525_v52 = vld [vmem:[%s3472_s0 + $0xc0] sm:$0xff]   ;;  %v2527_v54 = vld [vmem:[%s3472_s0 + $0xc8] sm:$0xff]   ;;  %v2529_v56 = vld [vmem:[%s3472_s0 + $0xd0] sm:$0xff]  }
  0x13   :  { %v2526_v53 = vld [vmem:[%s3472_s0 + $0x1c0] sm:$0xff]   ;;  %v2528_v55 = vld [vmem:[%s3472_s0 + $0x1c8] sm:$0xff]   ;;  %v2530_v57 = vld [vmem:[%s3472_s0 + $0x1d0] sm:$0xff]  }
  0x14   :  { %v2531_v58 = vld [vmem:[%s3472_s0 + $0xd8] sm:$0xff]   ;;  %v2533_v60 = vld [vmem:[%s3472_s0 + $0xe0] sm:$0xff]   ;;  %v2535_v62 = vld [vmem:[%s3472_s0 + $0xe8] sm:$0xff]  }
  0x15   :  { %v2532_v59 = vld [vmem:[%s3472_s0 + $0x1d8] sm:$0xff]   ;;  %v2534_v61 = vld [vmem:[%s3472_s0 + $0x1e0] sm:$0xff]   ;;  %v2536_v63 = vld [vmem:[%s3472_s0 + $0x1e8] sm:$0xff]  }
  0x16   :  { %2343 = vmatmul.mubr.msk.bf16.gmra.mxu0 %vm490_vm1, %v2483_v10  ;;  %2407 = vmatmul.mubr.msk.bf16.gmra.mxu1 %vm490_vm1, %v2484_v11  ;;  %v2537_v0 = vld [vmem:[%s3472_s0 + $0xf0] sm:$0xff]   ;;  %v2539_v2 = vld [vmem:[%s3472_s0 + $0xf8] sm:$0xff]   ;;  %v2829_v4 = vld [vmem:[%s3473_s2] ss:$0 sm:$0xff] }
  0x17   :  { %2346 = vmatprep.mubr.msk.bf16.mxu0 %vm490_vm1, %v2485_v12  ;;  %2410 = vmatprep.mubr.msk.bf16.mxu1 %vm490_vm1, %v2486_v13  ;;  %v2538_v1 = vld [vmem:[%s3472_s0 + $0x1f0] sm:$0xff]   ;;  %v2540_v3 = vld [vmem:[%s3472_s0 + $0x1f8] sm:$0xff]  }
  0x1e   :  { %2347 = vmatmul.mubr.msk.bf16.gmra.mxu0 %vm490_vm1, %v2487_v14  ;;  %2411 = vmatmul.mubr.msk.bf16.gmra.mxu1 %vm490_vm1, %v2488_v15 }
  0x1f   :  { %2350 = vmatprep.mubr.msk.bf16.mxu0 %vm490_vm1, %v2489_v16  ;;  %2414 = vmatprep.mubr.msk.bf16.mxu1 %vm490_vm1, %v2490_v17 }
  0x26   :  { %2351 = vmatmul.mubr.msk.bf16.gmra.mxu0 %vm490_vm1, %v2491_v18  ;;  %2415 = vmatmul.mubr.msk.bf16.gmra.mxu1 %vm490_vm1, %v2492_v19 }
  0x27   :  { %2354 = vmatprep.mubr.msk.bf16.mxu0 %vm490_vm1, %v2493_v20  ;;  %2418 = vmatprep.mubr.msk.bf16.mxu1 %vm490_vm1, %v2494_v21 }
  0x2e   :  { %2355 = vmatmul.mubr.msk.bf16.gmra.mxu0 %vm490_vm1, %v2495_v22  ;;  %2419 = vmatmul.mubr.msk.bf16.gmra.mxu1 %vm490_vm1, %v2496_v23 }
  0x2f   :  { %2358 = vmatprep.mubr.msk.bf16.mxu0 %vm490_vm1, %v2497_v24  ;;  %2422 = vmatprep.mubr.msk.bf16.mxu1 %vm490_vm1, %v2498_v25 }
  0x36   :  { %2359 = vmatmul.mubr.msk.bf16.gmra.mxu0 %vm490_vm1, %v2499_v26  ;;  %2423 = vmatmul.mubr.msk.bf16.gmra.mxu1 %vm490_vm1, %v2500_v27 }
  0x37   :  { %2362 = vmatprep.mubr.msk.bf16.mxu0 %vm490_vm1, %v2501_v28  ;;  %2426 = vmatprep.mubr.msk.bf16.mxu1 %vm490_vm1, %v2502_v29 }
  0x3e   :  { %2363 = vmatmul.mubr.msk.bf16.gmra.mxu0 %vm490_vm1, %v2503_v30  ;;  %2427 = vmatmul.mubr.msk.bf16.gmra.mxu1 %vm490_vm1, %v2504_v31 }
  0x3f   :  { %2366 = vmatprep.mubr.msk.bf16.mxu0 %vm490_vm1, %v2505_v32  ;;  %2430 = vmatprep.mubr.msk.bf16.mxu1 %vm490_vm1, %v2506_v33 }
  0x46   :  { %2367 = vmatmul.mubr.msk.bf16.gmra.mxu0 %vm490_vm1, %v2507_v34  ;;  %2431 = vmatmul.mubr.msk.bf16.gmra.mxu1 %vm490_vm1, %v2508_v35 }
  0x47   :  { %2370 = vmatprep.mubr.msk.bf16.mxu0 %vm490_vm1, %v2509_v36  ;;  %2434 = vmatprep.mubr.msk.bf16.mxu1 %vm490_vm1, %v2510_v37 }
  0x4e   :  { %2371 = vmatmul.mubr.msk.bf16.gmra.mxu0 %vm490_vm1, %v2511_v38  ;;  %2435 = vmatmul.mubr.msk.bf16.gmra.mxu1 %vm490_vm1, %v2512_v39 }
  0x4f   :  { %2374 = vmatprep.mubr.msk.bf16.mxu0 %vm490_vm1, %v2513_v40  ;;  %2438 = vmatprep.mubr.msk.bf16.mxu1 %vm490_vm1, %v2514_v41 }
  0x56   :  { %2375 = vmatmul.mubr.msk.bf16.gmra.mxu0 %vm490_vm1, %v2515_v42  ;;  %2439 = vmatmul.mubr.msk.bf16.gmra.mxu1 %vm490_vm1, %v2516_v43 }
  0x57   :  { %2378 = vmatprep.mubr.msk.bf16.mxu0 %vm490_vm1, %v2517_v44  ;;  %2442 = vmatprep.mubr.msk.bf16.mxu1 %vm490_vm1, %v2518_v45 }
  0x5e   :  { %2379 = vmatmul.mubr.msk.bf16.gmra.mxu0 %vm490_vm1, %v2519_v46  ;;  %2443 = vmatmul.mubr.msk.bf16.gmra.mxu1 %vm490_vm1, %v2520_v47 }
  0x5f   :  { %2382 = vmatprep.mubr.msk.bf16.mxu0 %vm490_vm1, %v2521_v48  ;;  %2446 = vmatprep.mubr.msk.bf16.mxu1 %vm490_vm1, %v2522_v49 }
  0x66   :  { %2383 = vmatmul.mubr.msk.bf16.gmra.mxu0 %vm490_vm1, %v2523_v50  ;;  %2447 = vmatmul.mubr.msk.bf16.gmra.mxu1 %vm490_vm1, %v2524_v51 }
  0x67   :  { %2386 = vmatprep.mubr.msk.bf16.mxu0 %vm490_vm1, %v2525_v52  ;;  %2450 = vmatprep.mubr.msk.bf16.mxu1 %vm490_vm1, %v2526_v53 }
  0x6e   :  { %2387 = vmatmul.mubr.msk.bf16.gmra.mxu0 %vm490_vm1, %v2527_v54  ;;  %2451 = vmatmul.mubr.msk.bf16.gmra.mxu1 %vm490_vm1, %v2528_v55 }
  0x6f   :  { %2390 = vmatprep.mubr.msk.bf16.mxu0 %vm490_vm1, %v2529_v56  ;;  %2454 = vmatprep.mubr.msk.bf16.mxu1 %vm490_vm1, %v2530_v57 }
  0x76   :  { %2391 = vmatmul.mubr.msk.bf16.gmra.mxu0 %vm490_vm1, %v2531_v58  ;;  %2455 = vmatmul.mubr.msk.bf16.gmra.mxu1 %vm490_vm1, %v2532_v59 }
  0x77   :  { %2394 = vmatprep.mubr.msk.bf16.mxu0 %vm490_vm1, %v2533_v60  ;;  %2458 = vmatprep.mubr.msk.bf16.mxu1 %vm490_vm1, %v2534_v61 }
  0x7e   :  { %2395 = vmatmul.mubr.msk.bf16.gmra.mxu0 %vm490_vm1, %v2535_v62  ;;  %2459 = vmatmul.mubr.msk.bf16.gmra.mxu1 %vm490_vm1, %v2536_v63 }
  0x7f   :  { %2398 = vmatprep.mubr.msk.bf16.mxu0 %vm490_vm1, %v2537_v0  ;;  %2462 = vmatprep.mubr.msk.bf16.mxu1 %vm490_vm1, %v2538_v1 }
  0x86   :  { %2399 = vmatmul.mubr.msk.bf16.gmra.mxu0 %vm490_vm1, %v2539_v2  ;;  %2463 = vmatmul.mubr.msk.bf16.gmra.mxu1 %vm490_vm1, %v2540_v3 }
  0xce   :  { %v2340_v5 = vpop.f32.mrf.mxu0  ;;  %v2404_v6 = vpop.f32.mrf.mxu1 }
  0xcf   :  { %v730_v7 = vadd.f32 %v2340_v5, %v2829_v4  ;;  %v986_v8 = vadd.f32 %v2404_v6, %v2829_v4 }
  0xd0   :  { %v721_v9 = vpop.f32.mrf.mxu0  ;;  %v977_v10 = vpop.f32.mrf.mxu1 }
  0xd1   :  { %v2139_v11 = vpack.c.bf16 %v730_v7, %v730_v7  ;;  %v2203_v12 = vpack.c.bf16 %v986_v8, %v986_v8  ;;  %v722_v13 = vadd.f32 %v2829_v4, %v721_v9  ;;  %v978_v14 = vadd.f32 %v2829_v4, %v977_v10 }
  0xd2   :  { %v2341_v15 = vpop.f32.mrf.mxu0  ;;  %v2405_v16 = vpop.f32.mrf.mxu1 }
  0xd3   :  { %1747 = vst.msk [vmem:[%s3474_s3 + $0x8] sm:$0xf] %vm1744_vm2, %v2139_v11  ;;  %1811 = vst.msk [vmem:[%s3474_s3 + $0x108] sm:$0xf] %vm1744_vm2, %v2203_v12  ;;  %v2137_v17 = vpack.c.bf16 %v722_v13, %v722_v13  ;;  %v2201_v18 = vpack.c.bf16 %v978_v14, %v978_v14  ;;  %v733_v19 = vadd.f32 %v2341_v15, %v2829_v4 }
  0xd4   :  { %v989_v20 = vadd.f32 %v2405_v16, %v2829_v4  ;;  %v724_v21 = vpop.f32.mrf.mxu0  ;;  %v980_v22 = vpop.f32.mrf.mxu1 }
  0xd5   :  { %1745 = vst.msk [vmem:[%s3474_s3] sm:$0xf] %vm1744_vm2, %v2137_v17  ;;  %1809 = vst.msk [vmem:[%s3474_s3 + $0x100] sm:$0xf] %vm1744_vm2, %v2201_v18  ;;  %v2140_v23 = vpack.c.bf16 %v733_v19, %v733_v19  ;;  %v725_v25 = vadd.f32 %v2829_v4, %v724_v21  ;;  %v981_v26 = vadd.f32 %v2829_v4, %v980_v22 }
  0xd6   :  { %v2204_v24 = vpack.c.bf16 %v989_v20, %v989_v20  ;;  %v2344_v27 = vpop.f32.mrf.mxu0  ;;  %v2408_v28 = vpop.f32.mrf.mxu1 }
  0xd7   :  { %1748 = vst.msk [vmem:[%s3474_s3 + $0xc] sm:$0xf] %vm1744_vm2, %v2140_v23  ;;  %v2138_v29 = vpack.c.bf16 %v725_v25, %v725_v25  ;;  %v2202_v30 = vpack.c.bf16 %v981_v26, %v981_v26  ;;  %v746_v31 = vadd.f32 %v2344_v27, %v2829_v4  ;;  %v1002_v32 = vadd.f32 %v2408_v28, %v2829_v4 }
  0xd8   :  { %1812 = vst.msk [vmem:[%s3474_s3 + $0x10c] sm:$0xf] %vm1744_vm2, %v2204_v24  ;;  %v737_v33 = vpop.f32.mrf.mxu0  ;;  %v993_v34 = vpop.f32.mrf.mxu1 }
  0xd9   :  { %1746 = vst.msk [vmem:[%s3474_s3 + $0x4] sm:$0xf] %vm1744_vm2, %v2138_v29  ;;  %1810 = vst.msk [vmem:[%s3474_s3 + $0x104] sm:$0xf] %vm1744_vm2, %v2202_v30  ;;  %v2143_v35 = vpack.c.bf16 %v746_v31, %v746_v31  ;;  %v2207_v36 = vpack.c.bf16 %v1002_v32, %v1002_v32  ;;  %v738_v37 = vadd.f32 %v2829_v4, %v737_v33 }
  0xda   :  { %v994_v38 = vadd.f32 %v2829_v4, %v993_v34  ;;  %v2345_v39 = vpop.f32.mrf.mxu0  ;;  %v2409_v40 = vpop.f32.mrf.mxu1 }
  0xdb   :  { %1751 = vst.msk [vmem:[%s3474_s3 + $0x18] sm:$0xf] %vm1744_vm2, %v2143_v35  ;;  %1815 = vst.msk [vmem:[%s3474_s3 + $0x118] sm:$0xf] %vm1744_vm2, %v2207_v36  ;;  %v2141_v41 = vpack.c.bf16 %v738_v37, %v738_v37  ;;  %v749_v43 = vadd.f32 %v2345_v39, %v2829_v4  ;;  %v1005_v44 = vadd.f32 %v2409_v40, %v2829_v4 }
  0xdc   :  { %v2205_v42 = vpack.c.bf16 %v994_v38, %v994_v38  ;;  %v740_v45 = vpop.f32.mrf.mxu0  ;;  %v996_v46 = vpop.f32.mrf.mxu1 }
  0xdd   :  { %1749 = vst.msk [vmem:[%s3474_s3 + $0x10] sm:$0xf] %vm1744_vm2, %v2141_v41  ;;  %v2144_v47 = vpack.c.bf16 %v749_v43, %v749_v43  ;;  %v2208_v48 = vpack.c.bf16 %v1005_v44, %v1005_v44  ;;  %v741_v49 = vadd.f32 %v2829_v4, %v740_v45  ;;  %v997_v50 = vadd.f32 %v2829_v4, %v996_v46 }
  0xde   :  { %1813 = vst.msk [vmem:[%s3474_s3 + $0x110] sm:$0xf] %vm1744_vm2, %v2205_v42  ;;  %v2348_v51 = vpop.f32.mrf.mxu0  ;;  %v2412_v52 = vpop.f32.mrf.mxu1 }
  0xdf   :  { %1752 = vst.msk [vmem:[%s3474_s3 + $0x1c] sm:$0xf] %vm1744_vm2, %v2144_v47  ;;  %1816 = vst.msk [vmem:[%s3474_s3 + $0x11c] sm:$0xf] %vm1744_vm2, %v2208_v48  ;;  %v2142_v53 = vpack.c.bf16 %v741_v49, %v741_v49  ;;  %v2206_v54 = vpack.c.bf16 %v997_v50, %v997_v50  ;;  %v762_v55 = vadd.f32 %v2348_v51, %v2829_v4 }
  0xe0   :  { %v1018_v56 = vadd.f32 %v2412_v52, %v2829_v4  ;;  %v753_v57 = vpop.f32.mrf.mxu0  ;;  %v1009_v58 = vpop.f32.mrf.mxu1 }
  0xe1   :  { %1750 = vst.msk [vmem:[%s3474_s3 + $0x14] sm:$0xf] %vm1744_vm2, %v2142_v53  ;;  %1814 = vst.msk [vmem:[%s3474_s3 + $0x114] sm:$0xf] %vm1744_vm2, %v2206_v54  ;;  %v2147_v59 = vpack.c.bf16 %v762_v55, %v762_v55  ;;  %v754_v61 = vadd.f32 %v2829_v4, %v753_v57  ;;  %v1010_v62 = vadd.f32 %v2829_v4, %v1009_v58 }
  0xe2   :  { %v2211_v60 = vpack.c.bf16 %v1018_v56, %v1018_v56  ;;  %v2349_v63 = vpop.f32.mrf.mxu0  ;;  %v2413_v0 = vpop.f32.mrf.mxu1 }
  0xe3   :  { %1755 = vst.msk [vmem:[%s3474_s3 + $0x28] sm:$0xf] %vm1744_vm2, %v2147_v59  ;;  %v2145_v1 = vpack.c.bf16 %v754_v61, %v754_v61  ;;  %v2209_v2 = vpack.c.bf16 %v1010_v62, %v1010_v62  ;;  %v765_v3 = vadd.f32 %v2349_v63, %v2829_v4  ;;  %v1021_v5 = vadd.f32 %v2413_v0, %v2829_v4 }
  0xe4   :  { %1819 = vst.msk [vmem:[%s3474_s3 + $0x128] sm:$0xf] %vm1744_vm2, %v2211_v60  ;;  %v756_v6 = vpop.f32.mrf.mxu0  ;;  %v1012_v7 = vpop.f32.mrf.mxu1 }
  0xe5   :  { %1753 = vst.msk [vmem:[%s3474_s3 + $0x20] sm:$0xf] %vm1744_vm2, %v2145_v1  ;;  %1817 = vst.msk [vmem:[%s3474_s3 + $0x120] sm:$0xf] %vm1744_vm2, %v2209_v2  ;;  %v2148_v8 = vpack.c.bf16 %v765_v3, %v765_v3  ;;  %v2212_v9 = vpack.c.bf16 %v1021_v5, %v1021_v5  ;;  %v757_v10 = vadd.f32 %v2829_v4, %v756_v6 }
  0xe6   :  { %v1013_v11 = vadd.f32 %v2829_v4, %v1012_v7  ;;  %v2352_v12 = vpop.f32.mrf.mxu0  ;;  %v2416_v13 = vpop.f32.mrf.mxu1 }
  0xe7   :  { %1756 = vst.msk [vmem:[%s3474_s3 + $0x2c] sm:$0xf] %vm1744_vm2, %v2148_v8  ;;  %1820 = vst.msk [vmem:[%s3474_s3 + $0x12c] sm:$0xf] %vm1744_vm2, %v2212_v9  ;;  %v2146_v14 = vpack.c.bf16 %v757_v10, %v757_v10  ;;  %v778_v16 = vadd.f32 %v2352_v12, %v2829_v4  ;;  %v1034_v17 = vadd.f32 %v2416_v13, %v2829_v4 }
  0xe8   :  { %v2210_v15 = vpack.c.bf16 %v1013_v11, %v1013_v11  ;;  %v769_v18 = vpop.f32.mrf.mxu0  ;;  %v1025_v19 = vpop.f32.mrf.mxu1 }
  0xe9   :  { %1754 = vst.msk [vmem:[%s3474_s3 + $0x24] sm:$0xf] %vm1744_vm2, %v2146_v14  ;;  %v2151_v20 = vpack.c.bf16 %v778_v16, %v778_v16  ;;  %v2215_v21 = vpack.c.bf16 %v1034_v17, %v1034_v17  ;;  %v770_v22 = vadd.f32 %v2829_v4, %v769_v18  ;;  %v1026_v23 = vadd.f32 %v2829_v4, %v1025_v19 }
  0xea   :  { %1818 = vst.msk [vmem:[%s3474_s3 + $0x124] sm:$0xf] %vm1744_vm2, %v2210_v15  ;;  %v2353_v24 = vpop.f32.mrf.mxu0  ;;  %v2417_v25 = vpop.f32.mrf.mxu1 }
  0xeb   :  { %1759 = vst.msk [vmem:[%s3474_s3 + $0x38] sm:$0xf] %vm1744_vm2, %v2151_v20  ;;  %1823 = vst.msk [vmem:[%s3474_s3 + $0x138] sm:$0xf] %vm1744_vm2, %v2215_v21  ;;  %v2149_v26 = vpack.c.bf16 %v770_v22, %v770_v22  ;;  %v2213_v27 = vpack.c.bf16 %v1026_v23, %v1026_v23  ;;  %v781_v28 = vadd.f32 %v2353_v24, %v2829_v4 }
  0xec   :  { %v1037_v29 = vadd.f32 %v2417_v25, %v2829_v4  ;;  %v772_v30 = vpop.f32.mrf.mxu0  ;;  %v1028_v31 = vpop.f32.mrf.mxu1 }
  0xed   :  { %1757 = vst.msk [vmem:[%s3474_s3 + $0x30] sm:$0xf] %vm1744_vm2, %v2149_v26  ;;  %1821 = vst.msk [vmem:[%s3474_s3 + $0x130] sm:$0xf] %vm1744_vm2, %v2213_v27  ;;  %v2152_v32 = vpack.c.bf16 %v781_v28, %v781_v28  ;;  %v773_v34 = vadd.f32 %v2829_v4, %v772_v30  ;;  %v1029_v35 = vadd.f32 %v2829_v4, %v1028_v31 }
  0xee   :  { %v2216_v33 = vpack.c.bf16 %v1037_v29, %v1037_v29  ;;  %v2356_v36 = vpop.f32.mrf.mxu0  ;;  %v2420_v37 = vpop.f32.mrf.mxu1 }
  0xef   :  { %1760 = vst.msk [vmem:[%s3474_s3 + $0x3c] sm:$0xf] %vm1744_vm2, %v2152_v32  ;;  %v2150_v38 = vpack.c.bf16 %v773_v34, %v773_v34  ;;  %v2214_v39 = vpack.c.bf16 %v1029_v35, %v1029_v35  ;;  %v794_v40 = vadd.f32 %v2356_v36, %v2829_v4  ;;  %v1050_v41 = vadd.f32 %v2420_v37, %v2829_v4 }
  0xf0   :  { %1824 = vst.msk [vmem:[%s3474_s3 + $0x13c] sm:$0xf] %vm1744_vm2, %v2216_v33  ;;  %v785_v42 = vpop.f32.mrf.mxu0  ;;  %v1041_v43 = vpop.f32.mrf.mxu1 }
  0xf1   :  { %1758 = vst.msk [vmem:[%s3474_s3 + $0x34] sm:$0xf] %vm1744_vm2, %v2150_v38  ;;  %1822 = vst.msk [vmem:[%s3474_s3 + $0x134] sm:$0xf] %vm1744_vm2, %v2214_v39  ;;  %v2155_v44 = vpack.c.bf16 %v794_v40, %v794_v40  ;;  %v2219_v45 = vpack.c.bf16 %v1050_v41, %v1050_v41  ;;  %v786_v46 = vadd.f32 %v2829_v4, %v785_v42 }
  0xf2   :  { %v1042_v47 = vadd.f32 %v2829_v4, %v1041_v43  ;;  %v2357_v48 = vpop.f32.mrf.mxu0  ;;  %v2421_v49 = vpop.f32.mrf.mxu1 }
  0xf3   :  { %1763 = vst.msk [vmem:[%s3474_s3 + $0x48] sm:$0xf] %vm1744_vm2, %v2155_v44  ;;  %1827 = vst.msk [vmem:[%s3474_s3 + $0x148] sm:$0xf] %vm1744_vm2, %v2219_v45  ;;  %v2153_v50 = vpack.c.bf16 %v786_v46, %v786_v46  ;;  %v797_v52 = vadd.f32 %v2357_v48, %v2829_v4  ;;  %v1053_v53 = vadd.f32 %v2421_v49, %v2829_v4 }
  0xf4   :  { %v2217_v51 = vpack.c.bf16 %v1042_v47, %v1042_v47  ;;  %v788_v54 = vpop.f32.mrf.mxu0  ;;  %v1044_v55 = vpop.f32.mrf.mxu1 }
  0xf5   :  { %1761 = vst.msk [vmem:[%s3474_s3 + $0x40] sm:$0xf] %vm1744_vm2, %v2153_v50  ;;  %v2156_v56 = vpack.c.bf16 %v797_v52, %v797_v52  ;;  %v2220_v57 = vpack.c.bf16 %v1053_v53, %v1053_v53  ;;  %v789_v58 = vadd.f32 %v2829_v4, %v788_v54  ;;  %v1045_v59 = vadd.f32 %v2829_v4, %v1044_v55 }
  0xf6   :  { %1825 = vst.msk [vmem:[%s3474_s3 + $0x140] sm:$0xf] %vm1744_vm2, %v2217_v51  ;;  %v2360_v60 = vpop.f32.mrf.mxu0  ;;  %v2424_v61 = vpop.f32.mrf.mxu1 }
  0xf7   :  { %1764 = vst.msk [vmem:[%s3474_s3 + $0x4c] sm:$0xf] %vm1744_vm2, %v2156_v56  ;;  %1828 = vst.msk [vmem:[%s3474_s3 + $0x14c] sm:$0xf] %vm1744_vm2, %v2220_v57  ;;  %v2154_v62 = vpack.c.bf16 %v789_v58, %v789_v58  ;;  %v2218_v63 = vpack.c.bf16 %v1045_v59, %v1045_v59  ;;  %v810_v0 = vadd.f32 %v2360_v60, %v2829_v4 }
  0xf8   :  { %v1066_v1 = vadd.f32 %v2424_v61, %v2829_v4  ;;  %v801_v2 = vpop.f32.mrf.mxu0  ;;  %v1057_v3 = vpop.f32.mrf.mxu1 }
  0xf9   :  { %1762 = vst.msk [vmem:[%s3474_s3 + $0x44] sm:$0xf] %vm1744_vm2, %v2154_v62  ;;  %1826 = vst.msk [vmem:[%s3474_s3 + $0x144] sm:$0xf] %vm1744_vm2, %v2218_v63  ;;  %v2159_v5 = vpack.c.bf16 %v810_v0, %v810_v0  ;;  %v802_v7 = vadd.f32 %v2829_v4, %v801_v2  ;;  %v1058_v8 = vadd.f32 %v2829_v4, %v1057_v3 }
  0xfa   :  { %v2223_v6 = vpack.c.bf16 %v1066_v1, %v1066_v1  ;;  %v2361_v9 = vpop.f32.mrf.mxu0  ;;  %v2425_v10 = vpop.f32.mrf.mxu1 }
  0xfb   :  { %1767 = vst.msk [vmem:[%s3474_s3 + $0x58] sm:$0xf] %vm1744_vm2, %v2159_v5  ;;  %v2157_v11 = vpack.c.bf16 %v802_v7, %v802_v7  ;;  %v2221_v12 = vpack.c.bf16 %v1058_v8, %v1058_v8  ;;  %v813_v13 = vadd.f32 %v2361_v9, %v2829_v4  ;;  %v1069_v14 = vadd.f32 %v2425_v10, %v2829_v4 }
  0xfc   :  { %1831 = vst.msk [vmem:[%s3474_s3 + $0x158] sm:$0xf] %vm1744_vm2, %v2223_v6  ;;  %v804_v15 = vpop.f32.mrf.mxu0  ;;  %v1060_v16 = vpop.f32.mrf.mxu1 }
  0xfd   :  { %1765 = vst.msk [vmem:[%s3474_s3 + $0x50] sm:$0xf] %vm1744_vm2, %v2157_v11  ;;  %1829 = vst.msk [vmem:[%s3474_s3 + $0x150] sm:$0xf] %vm1744_vm2, %v2221_v12  ;;  %v2160_v17 = vpack.c.bf16 %v813_v13, %v813_v13  ;;  %v2224_v18 = vpack.c.bf16 %v1069_v14, %v1069_v14  ;;  %v805_v19 = vadd.f32 %v2829_v4, %v804_v15 }
  0xfe   :  { %v1061_v20 = vadd.f32 %v2829_v4, %v1060_v16  ;;  %v2364_v21 = vpop.f32.mrf.mxu0  ;;  %v2428_v22 = vpop.f32.mrf.mxu1 }
  0xff   :  { %1768 = vst.msk [vmem:[%s3474_s3 + $0x5c] sm:$0xf] %vm1744_vm2, %v2160_v17  ;;  %1832 = vst.msk [vmem:[%s3474_s3 + $0x15c] sm:$0xf] %vm1744_vm2, %v2224_v18  ;;  %v2158_v23 = vpack.c.bf16 %v805_v19, %v805_v19  ;;  %v826_v25 = vadd.f32 %v2364_v21, %v2829_v4  ;;  %v1082_v26 = vadd.f32 %v2428_v22, %v2829_v4 }
 0x100   :  { %v2222_v24 = vpack.c.bf16 %v1061_v20, %v1061_v20  ;;  %v817_v27 = vpop.f32.mrf.mxu0  ;;  %v1073_v28 = vpop.f32.mrf.mxu1 }
 0x101   :  { %1766 = vst.msk [vmem:[%s3474_s3 + $0x54] sm:$0xf] %vm1744_vm2, %v2158_v23  ;;  %v2163_v29 = vpack.c.bf16 %v826_v25, %v826_v25  ;;  %v2227_v30 = vpack.c.bf16 %v1082_v26, %v1082_v26  ;;  %v818_v31 = vadd.f32 %v2829_v4, %v817_v27  ;;  %v1074_v32 = vadd.f32 %v2829_v4, %v1073_v28 }
 0x102   :  { %1830 = vst.msk [vmem:[%s3474_s3 + $0x154] sm:$0xf] %vm1744_vm2, %v2222_v24  ;;  %v2365_v33 = vpop.f32.mrf.mxu0  ;;  %v2429_v34 = vpop.f32.mrf.mxu1 }
 0x103   :  { %1771 = vst.msk [vmem:[%s3474_s3 + $0x68] sm:$0xf] %vm1744_vm2, %v2163_v29  ;;  %1835 = vst.msk [vmem:[%s3474_s3 + $0x168] sm:$0xf] %vm1744_vm2, %v2227_v30  ;;  %v2161_v35 = vpack.c.bf16 %v818_v31, %v818_v31  ;;  %v2225_v36 = vpack.c.bf16 %v1074_v32, %v1074_v32  ;;  %v829_v37 = vadd.f32 %v2365_v33, %v2829_v4 }
 0x104   :  { %v1085_v38 = vadd.f32 %v2429_v34, %v2829_v4  ;;  %v820_v39 = vpop.f32.mrf.mxu0  ;;  %v1076_v40 = vpop.f32.mrf.mxu1 }
 0x105   :  { %1769 = vst.msk [vmem:[%s3474_s3 + $0x60] sm:$0xf] %vm1744_vm2, %v2161_v35  ;;  %1833 = vst.msk [vmem:[%s3474_s3 + $0x160] sm:$0xf] %vm1744_vm2, %v2225_v36  ;;  %v2164_v41 = vpack.c.bf16 %v829_v37, %v829_v37  ;;  %v821_v43 = vadd.f32 %v2829_v4, %v820_v39  ;;  %v1077_v44 = vadd.f32 %v2829_v4, %v1076_v40 }
 0x106   :  { %v2228_v42 = vpack.c.bf16 %v1085_v38, %v1085_v38  ;;  %v2368_v45 = vpop.f32.mrf.mxu0  ;;  %v2432_v46 = vpop.f32.mrf.mxu1 }
 0x107   :  { %1772 = vst.msk [vmem:[%s3474_s3 + $0x6c] sm:$0xf] %vm1744_vm2, %v2164_v41  ;;  %v2162_v47 = vpack.c.bf16 %v821_v43, %v821_v43  ;;  %v2226_v48 = vpack.c.bf16 %v1077_v44, %v1077_v44  ;;  %v842_v49 = vadd.f32 %v2368_v45, %v2829_v4  ;;  %v1098_v50 = vadd.f32 %v2432_v46, %v2829_v4 }
 0x108   :  { %1836 = vst.msk [vmem:[%s3474_s3 + $0x16c] sm:$0xf] %vm1744_vm2, %v2228_v42  ;;  %v833_v51 = vpop.f32.mrf.mxu0  ;;  %v1089_v52 = vpop.f32.mrf.mxu1 }
 0x109   :  { %1770 = vst.msk [vmem:[%s3474_s3 + $0x64] sm:$0xf] %vm1744_vm2, %v2162_v47  ;;  %1834 = vst.msk [vmem:[%s3474_s3 + $0x164] sm:$0xf] %vm1744_vm2, %v2226_v48  ;;  %v2167_v53 = vpack.c.bf16 %v842_v49, %v842_v49  ;;  %v2231_v54 = vpack.c.bf16 %v1098_v50, %v1098_v50  ;;  %v834_v55 = vadd.f32 %v2829_v4, %v833_v51 }
 0x10a   :  { %v1090_v56 = vadd.f32 %v2829_v4, %v1089_v52  ;;  %v2369_v57 = vpop.f32.mrf.mxu0  ;;  %v2433_v58 = vpop.f32.mrf.mxu1 }
 0x10b   :  { %1775 = vst.msk [vmem:[%s3474_s3 + $0x78] sm:$0xf] %vm1744_vm2, %v2167_v53  ;;  %1839 = vst.msk [vmem:[%s3474_s3 + $0x178] sm:$0xf] %vm1744_vm2, %v2231_v54  ;;  %v2165_v59 = vpack.c.bf16 %v834_v55, %v834_v55  ;;  %v845_v61 = vadd.f32 %v2369_v57, %v2829_v4  ;;  %v1101_v62 = vadd.f32 %v2433_v58, %v2829_v4 }
 0x10c   :  { %v2229_v60 = vpack.c.bf16 %v1090_v56, %v1090_v56  ;;  %v836_v63 = vpop.f32.mrf.mxu0  ;;  %v1092_v0 = vpop.f32.mrf.mxu1 }
 0x10d   :  { %1773 = vst.msk [vmem:[%s3474_s3 + $0x70] sm:$0xf] %vm1744_vm2, %v2165_v59  ;;  %v2168_v1 = vpack.c.bf16 %v845_v61, %v845_v61  ;;  %v2232_v2 = vpack.c.bf16 %v1101_v62, %v1101_v62  ;;  %v837_v3 = vadd.f32 %v2829_v4, %v836_v63  ;;  %v1093_v5 = vadd.f32 %v2829_v4, %v1092_v0 }
 0x10e   :  { %1837 = vst.msk [vmem:[%s3474_s3 + $0x170] sm:$0xf] %vm1744_vm2, %v2229_v60  ;;  %v2372_v6 = vpop.f32.mrf.mxu0  ;;  %v2436_v7 = vpop.f32.mrf.mxu1 }
 0x10f   :  { %1776 = vst.msk [vmem:[%s3474_s3 + $0x7c] sm:$0xf] %vm1744_vm2, %v2168_v1  ;;  %1840 = vst.msk [vmem:[%s3474_s3 + $0x17c] sm:$0xf] %vm1744_vm2, %v2232_v2  ;;  %v2166_v8 = vpack.c.bf16 %v837_v3, %v837_v3  ;;  %v2230_v9 = vpack.c.bf16 %v1093_v5, %v1093_v5  ;;  %v858_v10 = vadd.f32 %v2372_v6, %v2829_v4 }
 0x110   :  { %v1114_v11 = vadd.f32 %v2436_v7, %v2829_v4  ;;  %v849_v12 = vpop.f32.mrf.mxu0  ;;  %v1105_v13 = vpop.f32.mrf.mxu1 }
 0x111   :  { %1774 = vst.msk [vmem:[%s3474_s3 + $0x74] sm:$0xf] %vm1744_vm2, %v2166_v8  ;;  %1838 = vst.msk [vmem:[%s3474_s3 + $0x174] sm:$0xf] %vm1744_vm2, %v2230_v9  ;;  %v2171_v14 = vpack.c.bf16 %v858_v10, %v858_v10  ;;  %v850_v16 = vadd.f32 %v2829_v4, %v849_v12  ;;  %v1106_v17 = vadd.f32 %v2829_v4, %v1105_v13 }
 0x112   :  { %v2235_v15 = vpack.c.bf16 %v1114_v11, %v1114_v11  ;;  %v2373_v18 = vpop.f32.mrf.mxu0  ;;  %v2437_v19 = vpop.f32.mrf.mxu1 }
 0x113   :  { %1779 = vst.msk [vmem:[%s3474_s3 + $0x88] sm:$0xf] %vm1744_vm2, %v2171_v14  ;;  %v2169_v20 = vpack.c.bf16 %v850_v16, %v850_v16  ;;  %v2233_v21 = vpack.c.bf16 %v1106_v17, %v1106_v17  ;;  %v861_v22 = vadd.f32 %v2373_v18, %v2829_v4  ;;  %v1117_v23 = vadd.f32 %v2437_v19, %v2829_v4 }
 0x114   :  { %1843 = vst.msk [vmem:[%s3474_s3 + $0x188] sm:$0xf] %vm1744_vm2, %v2235_v15  ;;  %v852_v24 = vpop.f32.mrf.mxu0  ;;  %v1108_v25 = vpop.f32.mrf.mxu1 }
 0x115   :  { %1777 = vst.msk [vmem:[%s3474_s3 + $0x80] sm:$0xf] %vm1744_vm2, %v2169_v20  ;;  %1841 = vst.msk [vmem:[%s3474_s3 + $0x180] sm:$0xf] %vm1744_vm2, %v2233_v21  ;;  %v2172_v26 = vpack.c.bf16 %v861_v22, %v861_v22  ;;  %v2236_v27 = vpack.c.bf16 %v1117_v23, %v1117_v23  ;;  %v853_v28 = vadd.f32 %v2829_v4, %v852_v24 }
 0x116   :  { %v1109_v29 = vadd.f32 %v2829_v4, %v1108_v25  ;;  %v2376_v30 = vpop.f32.mrf.mxu0  ;;  %v2440_v31 = vpop.f32.mrf.mxu1 }
 0x117   :  { %1780 = vst.msk [vmem:[%s3474_s3 + $0x8c] sm:$0xf] %vm1744_vm2, %v2172_v26  ;;  %1844 = vst.msk [vmem:[%s3474_s3 + $0x18c] sm:$0xf] %vm1744_vm2, %v2236_v27  ;;  %v2170_v32 = vpack.c.bf16 %v853_v28, %v853_v28  ;;  %v874_v34 = vadd.f32 %v2376_v30, %v2829_v4  ;;  %v1130_v35 = vadd.f32 %v2440_v31, %v2829_v4 }
 0x118   :  { %v2234_v33 = vpack.c.bf16 %v1109_v29, %v1109_v29  ;;  %v865_v36 = vpop.f32.mrf.mxu0  ;;  %v1121_v37 = vpop.f32.mrf.mxu1 }
 0x119   :  { %1778 = vst.msk [vmem:[%s3474_s3 + $0x84] sm:$0xf] %vm1744_vm2, %v2170_v32  ;;  %v2175_v38 = vpack.c.bf16 %v874_v34, %v874_v34  ;;  %v2239_v39 = vpack.c.bf16 %v1130_v35, %v1130_v35  ;;  %v866_v40 = vadd.f32 %v2829_v4, %v865_v36  ;;  %v1122_v41 = vadd.f32 %v2829_v4, %v1121_v37 }
 0x11a   :  { %1842 = vst.msk [vmem:[%s3474_s3 + $0x184] sm:$0xf] %vm1744_vm2, %v2234_v33  ;;  %v2377_v42 = vpop.f32.mrf.mxu0  ;;  %v2441_v43 = vpop.f32.mrf.mxu1 }
 0x11b   :  { %1783 = vst.msk [vmem:[%s3474_s3 + $0x98] sm:$0xf] %vm1744_vm2, %v2175_v38  ;;  %1847 = vst.msk [vmem:[%s3474_s3 + $0x198] sm:$0xf] %vm1744_vm2, %v2239_v39  ;;  %v2173_v44 = vpack.c.bf16 %v866_v40, %v866_v40  ;;  %v2237_v45 = vpack.c.bf16 %v1122_v41, %v1122_v41  ;;  %v877_v46 = vadd.f32 %v2377_v42, %v2829_v4 }
 0x11c   :  { %v1133_v47 = vadd.f32 %v2441_v43, %v2829_v4  ;;  %v868_v48 = vpop.f32.mrf.mxu0  ;;  %v1124_v49 = vpop.f32.mrf.mxu1 }
 0x11d   :  { %1781 = vst.msk [vmem:[%s3474_s3 + $0x90] sm:$0xf] %vm1744_vm2, %v2173_v44  ;;  %1845 = vst.msk [vmem:[%s3474_s3 + $0x190] sm:$0xf] %vm1744_vm2, %v2237_v45  ;;  %v2176_v50 = vpack.c.bf16 %v877_v46, %v877_v46  ;;  %v869_v52 = vadd.f32 %v2829_v4, %v868_v48  ;;  %v1125_v53 = vadd.f32 %v2829_v4, %v1124_v49 }
 0x11e   :  { %v2240_v51 = vpack.c.bf16 %v1133_v47, %v1133_v47  ;;  %v2380_v54 = vpop.f32.mrf.mxu0  ;;  %v2444_v55 = vpop.f32.mrf.mxu1 }
 0x11f   :  { %1784 = vst.msk [vmem:[%s3474_s3 + $0x9c] sm:$0xf] %vm1744_vm2, %v2176_v50  ;;  %v2174_v56 = vpack.c.bf16 %v869_v52, %v869_v52  ;;  %v2238_v57 = vpack.c.bf16 %v1125_v53, %v1125_v53  ;;  %v890_v58 = vadd.f32 %v2380_v54, %v2829_v4  ;;  %v1146_v59 = vadd.f32 %v2444_v55, %v2829_v4 }
 0x120   :  { %1848 = vst.msk [vmem:[%s3474_s3 + $0x19c] sm:$0xf] %vm1744_vm2, %v2240_v51  ;;  %v881_v60 = vpop.f32.mrf.mxu0  ;;  %v1137_v61 = vpop.f32.mrf.mxu1 }
 0x121   :  { %1782 = vst.msk [vmem:[%s3474_s3 + $0x94] sm:$0xf] %vm1744_vm2, %v2174_v56  ;;  %1846 = vst.msk [vmem:[%s3474_s3 + $0x194] sm:$0xf] %vm1744_vm2, %v2238_v57  ;;  %v2179_v62 = vpack.c.bf16 %v890_v58, %v890_v58  ;;  %v2243_v63 = vpack.c.bf16 %v1146_v59, %v1146_v59  ;;  %v882_v0 = vadd.f32 %v2829_v4, %v881_v60 }
 0x122   :  { %v1138_v1 = vadd.f32 %v2829_v4, %v1137_v61  ;;  %v2381_v2 = vpop.f32.mrf.mxu0  ;;  %v2445_v3 = vpop.f32.mrf.mxu1 }
 0x123   :  { %1787 = vst.msk [vmem:[%s3474_s3 + $0xa8] sm:$0xf] %vm1744_vm2, %v2179_v62  ;;  %1851 = vst.msk [vmem:[%s3474_s3 + $0x1a8] sm:$0xf] %vm1744_vm2, %v2243_v63  ;;  %v2177_v5 = vpack.c.bf16 %v882_v0, %v882_v0  ;;  %v893_v7 = vadd.f32 %v2381_v2, %v2829_v4  ;;  %v1149_v8 = vadd.f32 %v2445_v3, %v2829_v4 }
 0x124   :  { %v2241_v6 = vpack.c.bf16 %v1138_v1, %v1138_v1  ;;  %v884_v9 = vpop.f32.mrf.mxu0  ;;  %v1140_v10 = vpop.f32.mrf.mxu1 }
 0x125   :  { %1785 = vst.msk [vmem:[%s3474_s3 + $0xa0] sm:$0xf] %vm1744_vm2, %v2177_v5  ;;  %v2180_v11 = vpack.c.bf16 %v893_v7, %v893_v7  ;;  %v2244_v12 = vpack.c.bf16 %v1149_v8, %v1149_v8  ;;  %v885_v13 = vadd.f32 %v2829_v4, %v884_v9  ;;  %v1141_v14 = vadd.f32 %v2829_v4, %v1140_v10 }
 0x126   :  { %1849 = vst.msk [vmem:[%s3474_s3 + $0x1a0] sm:$0xf] %vm1744_vm2, %v2241_v6  ;;  %v2384_v15 = vpop.f32.mrf.mxu0  ;;  %v2448_v16 = vpop.f32.mrf.mxu1 }
 0x127   :  { %1788 = vst.msk [vmem:[%s3474_s3 + $0xac] sm:$0xf] %vm1744_vm2, %v2180_v11  ;;  %1852 = vst.msk [vmem:[%s3474_s3 + $0x1ac] sm:$0xf] %vm1744_vm2, %v2244_v12  ;;  %v2178_v17 = vpack.c.bf16 %v885_v13, %v885_v13  ;;  %v2242_v18 = vpack.c.bf16 %v1141_v14, %v1141_v14  ;;  %v906_v19 = vadd.f32 %v2384_v15, %v2829_v4 }
 0x128   :  { %v1162_v20 = vadd.f32 %v2448_v16, %v2829_v4  ;;  %v897_v21 = vpop.f32.mrf.mxu0  ;;  %v1153_v22 = vpop.f32.mrf.mxu1 }
 0x129   :  { %1786 = vst.msk [vmem:[%s3474_s3 + $0xa4] sm:$0xf] %vm1744_vm2, %v2178_v17  ;;  %1850 = vst.msk [vmem:[%s3474_s3 + $0x1a4] sm:$0xf] %vm1744_vm2, %v2242_v18  ;;  %v2183_v23 = vpack.c.bf16 %v906_v19, %v906_v19  ;;  %v898_v25 = vadd.f32 %v2829_v4, %v897_v21  ;;  %v1154_v26 = vadd.f32 %v2829_v4, %v1153_v22 }
 0x12a   :  { %v2247_v24 = vpack.c.bf16 %v1162_v20, %v1162_v20  ;;  %v2385_v27 = vpop.f32.mrf.mxu0  ;;  %v2449_v28 = vpop.f32.mrf.mxu1 }
 0x12b   :  { %1791 = vst.msk [vmem:[%s3474_s3 + $0xb8] sm:$0xf] %vm1744_vm2, %v2183_v23  ;;  %v2181_v29 = vpack.c.bf16 %v898_v25, %v898_v25  ;;  %v2245_v30 = vpack.c.bf16 %v1154_v26, %v1154_v26  ;;  %v909_v31 = vadd.f32 %v2385_v27, %v2829_v4  ;;  %v1165_v32 = vadd.f32 %v2449_v28, %v2829_v4 }
 0x12c   :  { %1855 = vst.msk [vmem:[%s3474_s3 + $0x1b8] sm:$0xf] %vm1744_vm2, %v2247_v24  ;;  %v900_v33 = vpop.f32.mrf.mxu0  ;;  %v1156_v34 = vpop.f32.mrf.mxu1 }
 0x12d   :  { %1789 = vst.msk [vmem:[%s3474_s3 + $0xb0] sm:$0xf] %vm1744_vm2, %v2181_v29  ;;  %1853 = vst.msk [vmem:[%s3474_s3 + $0x1b0] sm:$0xf] %vm1744_vm2, %v2245_v30  ;;  %v2184_v35 = vpack.c.bf16 %v909_v31, %v909_v31  ;;  %v2248_v36 = vpack.c.bf16 %v1165_v32, %v1165_v32  ;;  %v901_v37 = vadd.f32 %v2829_v4, %v900_v33 }
 0x12e   :  { %v1157_v38 = vadd.f32 %v2829_v4, %v1156_v34  ;;  %v2388_v39 = vpop.f32.mrf.mxu0  ;;  %v2452_v40 = vpop.f32.mrf.mxu1 }
 0x12f   :  { %1792 = vst.msk [vmem:[%s3474_s3 + $0xbc] sm:$0xf] %vm1744_vm2, %v2184_v35  ;;  %1856 = vst.msk [vmem:[%s3474_s3 + $0x1bc] sm:$0xf] %vm1744_vm2, %v2248_v36  ;;  %v2182_v41 = vpack.c.bf16 %v901_v37, %v901_v37  ;;  %v922_v43 = vadd.f32 %v2388_v39, %v2829_v4  ;;  %v1178_v44 = vadd.f32 %v2452_v40, %v2829_v4 }
 0x130   :  { %v2246_v42 = vpack.c.bf16 %v1157_v38, %v1157_v38  ;;  %v913_v45 = vpop.f32.mrf.mxu0  ;;  %v1169_v46 = vpop.f32.mrf.mxu1 }
 0x131   :  { %1790 = vst.msk [vmem:[%s3474_s3 + $0xb4] sm:$0xf] %vm1744_vm2, %v2182_v41  ;;  %v2187_v47 = vpack.c.bf16 %v922_v43, %v922_v43  ;;  %v2251_v48 = vpack.c.bf16 %v1178_v44, %v1178_v44  ;;  %v914_v49 = vadd.f32 %v2829_v4, %v913_v45  ;;  %v1170_v50 = vadd.f32 %v2829_v4, %v1169_v46 }
 0x132   :  { %1854 = vst.msk [vmem:[%s3474_s3 + $0x1b4] sm:$0xf] %vm1744_vm2, %v2246_v42  ;;  %v2389_v51 = vpop.f32.mrf.mxu0  ;;  %v2453_v52 = vpop.f32.mrf.mxu1 }
 0x133   :  { %1795 = vst.msk [vmem:[%s3474_s3 + $0xc8] sm:$0xf] %vm1744_vm2, %v2187_v47  ;;  %1859 = vst.msk [vmem:[%s3474_s3 + $0x1c8] sm:$0xf] %vm1744_vm2, %v2251_v48  ;;  %v2185_v53 = vpack.c.bf16 %v914_v49, %v914_v49  ;;  %v2249_v54 = vpack.c.bf16 %v1170_v50, %v1170_v50  ;;  %v925_v55 = vadd.f32 %v2389_v51, %v2829_v4 }
 0x134   :  { %v1181_v56 = vadd.f32 %v2453_v52, %v2829_v4  ;;  %v916_v57 = vpop.f32.mrf.mxu0  ;;  %v1172_v58 = vpop.f32.mrf.mxu1 }
 0x135   :  { %1793 = vst.msk [vmem:[%s3474_s3 + $0xc0] sm:$0xf] %vm1744_vm2, %v2185_v53  ;;  %1857 = vst.msk [vmem:[%s3474_s3 + $0x1c0] sm:$0xf] %vm1744_vm2, %v2249_v54  ;;  %v2188_v59 = vpack.c.bf16 %v925_v55, %v925_v55  ;;  %v917_v61 = vadd.f32 %v2829_v4, %v916_v57  ;;  %v1173_v62 = vadd.f32 %v2829_v4, %v1172_v58 }
 0x136   :  { %v2252_v60 = vpack.c.bf16 %v1181_v56, %v1181_v56  ;;  %v2392_v63 = vpop.f32.mrf.mxu0  ;;  %v2456_v0 = vpop.f32.mrf.mxu1 }
 0x137   :  { %1796 = vst.msk [vmem:[%s3474_s3 + $0xcc] sm:$0xf] %vm1744_vm2, %v2188_v59  ;;  %v2186_v1 = vpack.c.bf16 %v917_v61, %v917_v61  ;;  %v2250_v2 = vpack.c.bf16 %v1173_v62, %v1173_v62  ;;  %v938_v3 = vadd.f32 %v2392_v63, %v2829_v4  ;;  %v1194_v5 = vadd.f32 %v2456_v0, %v2829_v4 }
 0x138   :  { %1860 = vst.msk [vmem:[%s3474_s3 + $0x1cc] sm:$0xf] %vm1744_vm2, %v2252_v60  ;;  %v929_v6 = vpop.f32.mrf.mxu0  ;;  %v1185_v7 = vpop.f32.mrf.mxu1 }
 0x139   :  { %1794 = vst.msk [vmem:[%s3474_s3 + $0xc4] sm:$0xf] %vm1744_vm2, %v2186_v1  ;;  %1858 = vst.msk [vmem:[%s3474_s3 + $0x1c4] sm:$0xf] %vm1744_vm2, %v2250_v2  ;;  %v2191_v8 = vpack.c.bf16 %v938_v3, %v938_v3  ;;  %v2255_v9 = vpack.c.bf16 %v1194_v5, %v1194_v5  ;;  %v930_v10 = vadd.f32 %v2829_v4, %v929_v6 }
 0x13a   :  { %v1186_v11 = vadd.f32 %v2829_v4, %v1185_v7  ;;  %v2393_v12 = vpop.f32.mrf.mxu0  ;;  %v2457_v13 = vpop.f32.mrf.mxu1 }
 0x13b   :  { %1799 = vst.msk [vmem:[%s3474_s3 + $0xd8] sm:$0xf] %vm1744_vm2, %v2191_v8  ;;  %1863 = vst.msk [vmem:[%s3474_s3 + $0x1d8] sm:$0xf] %vm1744_vm2, %v2255_v9  ;;  %v2189_v14 = vpack.c.bf16 %v930_v10, %v930_v10  ;;  %v941_v16 = vadd.f32 %v2393_v12, %v2829_v4  ;;  %v1197_v17 = vadd.f32 %v2457_v13, %v2829_v4 }
 0x13c   :  { %v2253_v15 = vpack.c.bf16 %v1186_v11, %v1186_v11  ;;  %v932_v18 = vpop.f32.mrf.mxu0  ;;  %v1188_v19 = vpop.f32.mrf.mxu1 }
 0x13d   :  { %1797 = vst.msk [vmem:[%s3474_s3 + $0xd0] sm:$0xf] %vm1744_vm2, %v2189_v14  ;;  %v2192_v20 = vpack.c.bf16 %v941_v16, %v941_v16  ;;  %v2256_v21 = vpack.c.bf16 %v1197_v17, %v1197_v17  ;;  %v933_v22 = vadd.f32 %v2829_v4, %v932_v18  ;;  %v1189_v23 = vadd.f32 %v2829_v4, %v1188_v19 }
 0x13e   :  { %1861 = vst.msk [vmem:[%s3474_s3 + $0x1d0] sm:$0xf] %vm1744_vm2, %v2253_v15  ;;  %v2396_v24 = vpop.f32.mrf.mxu0  ;;  %v2460_v25 = vpop.f32.mrf.mxu1 }
 0x13f   :  { %1800 = vst.msk [vmem:[%s3474_s3 + $0xdc] sm:$0xf] %vm1744_vm2, %v2192_v20  ;;  %1864 = vst.msk [vmem:[%s3474_s3 + $0x1dc] sm:$0xf] %vm1744_vm2, %v2256_v21  ;;  %v2190_v26 = vpack.c.bf16 %v933_v22, %v933_v22  ;;  %v2254_v27 = vpack.c.bf16 %v1189_v23, %v1189_v23  ;;  %v954_v28 = vadd.f32 %v2396_v24, %v2829_v4 }
 0x140   :  { %v1210_v29 = vadd.f32 %v2460_v25, %v2829_v4  ;;  %v945_v30 = vpop.f32.mrf.mxu0  ;;  %v1201_v31 = vpop.f32.mrf.mxu1 }
 0x141   :  { %1798 = vst.msk [vmem:[%s3474_s3 + $0xd4] sm:$0xf] %vm1744_vm2, %v2190_v26  ;;  %1862 = vst.msk [vmem:[%s3474_s3 + $0x1d4] sm:$0xf] %vm1744_vm2, %v2254_v27  ;;  %v2195_v32 = vpack.c.bf16 %v954_v28, %v954_v28  ;;  %v946_v34 = vadd.f32 %v2829_v4, %v945_v30  ;;  %v1202_v35 = vadd.f32 %v2829_v4, %v1201_v31 }
 0x142   :  { %v2259_v33 = vpack.c.bf16 %v1210_v29, %v1210_v29  ;;  %v2397_v36 = vpop.f32.mrf.mxu0  ;;  %v2461_v37 = vpop.f32.mrf.mxu1 }
 0x143   :  { %1803 = vst.msk [vmem:[%s3474_s3 + $0xe8] sm:$0xf] %vm1744_vm2, %v2195_v32  ;;  %v2193_v38 = vpack.c.bf16 %v946_v34, %v946_v34  ;;  %v2257_v39 = vpack.c.bf16 %v1202_v35, %v1202_v35  ;;  %v957_v40 = vadd.f32 %v2397_v36, %v2829_v4  ;;  %v1213_v41 = vadd.f32 %v2461_v37, %v2829_v4 }
 0x144   :  { %1867 = vst.msk [vmem:[%s3474_s3 + $0x1e8] sm:$0xf] %vm1744_vm2, %v2259_v33  ;;  %v948_v42 = vpop.f32.mrf.mxu0  ;;  %v1204_v43 = vpop.f32.mrf.mxu1 }
 0x145   :  { %1801 = vst.msk [vmem:[%s3474_s3 + $0xe0] sm:$0xf] %vm1744_vm2, %v2193_v38  ;;  %1865 = vst.msk [vmem:[%s3474_s3 + $0x1e0] sm:$0xf] %vm1744_vm2, %v2257_v39  ;;  %v2196_v44 = vpack.c.bf16 %v957_v40, %v957_v40  ;;  %v2260_v45 = vpack.c.bf16 %v1213_v41, %v1213_v41  ;;  %v949_v46 = vadd.f32 %v2829_v4, %v948_v42 }
 0x146   :  { %v1205_v47 = vadd.f32 %v2829_v4, %v1204_v43  ;;  %v2400_v48 = vpop.f32.mrf.mxu0  ;;  %v2464_v49 = vpop.f32.mrf.mxu1 }
 0x147   :  { %1804 = vst.msk [vmem:[%s3474_s3 + $0xec] sm:$0xf] %vm1744_vm2, %v2196_v44  ;;  %1868 = vst.msk [vmem:[%s3474_s3 + $0x1ec] sm:$0xf] %vm1744_vm2, %v2260_v45  ;;  %v2194_v50 = vpack.c.bf16 %v949_v46, %v949_v46  ;;  %v970_v52 = vadd.f32 %v2400_v48, %v2829_v4  ;;  %v1226_v53 = vadd.f32 %v2464_v49, %v2829_v4 }
 0x148   :  { %v2258_v51 = vpack.c.bf16 %v1205_v47, %v1205_v47  ;;  %v961_v54 = vpop.f32.mrf.mxu0  ;;  %v1217_v55 = vpop.f32.mrf.mxu1 }
 0x149   :  { %1802 = vst.msk [vmem:[%s3474_s3 + $0xe4] sm:$0xf] %vm1744_vm2, %v2194_v50  ;;  %v2199_v56 = vpack.c.bf16 %v970_v52, %v970_v52  ;;  %v2263_v57 = vpack.c.bf16 %v1226_v53, %v1226_v53  ;;  %v962_v58 = vadd.f32 %v2829_v4, %v961_v54  ;;  %v1218_v59 = vadd.f32 %v2829_v4, %v1217_v55 }
 0x14a   :  { %1866 = vst.msk [vmem:[%s3474_s3 + $0x1e4] sm:$0xf] %vm1744_vm2, %v2258_v51  ;;  %v2401_v60 = vpop.f32.mrf.mxu0  ;;  %v2465_v61 = vpop.f32.mrf.mxu1 }
 0x14b   :  { %1807 = vst.msk [vmem:[%s3474_s3 + $0xf8] sm:$0xf] %vm1744_vm2, %v2199_v56  ;;  %1871 = vst.msk [vmem:[%s3474_s3 + $0x1f8] sm:$0xf] %vm1744_vm2, %v2263_v57  ;;  %v2197_v62 = vpack.c.bf16 %v962_v58, %v962_v58  ;;  %v2261_v63 = vpack.c.bf16 %v1218_v59, %v1218_v59  ;;  %v973_v0 = vadd.f32 %v2401_v60, %v2829_v4 }
 0x14c   :  { %v1229_v1 = vadd.f32 %v2465_v61, %v2829_v4  ;;  %v964_v2 = vpop.f32.mrf.mxu0  ;;  %v1220_v3 = vpop.f32.mrf.mxu1 }
 0x14d   :  { %1805 = vst.msk [vmem:[%s3474_s3 + $0xf0] sm:$0xf] %vm1744_vm2, %v2197_v62  ;;  %1869 = vst.msk [vmem:[%s3474_s3 + $0x1f0] sm:$0xf] %vm1744_vm2, %v2261_v63  ;;  %v2200_v5 = vpack.c.bf16 %v973_v0, %v973_v0  ;;  %v965_v7 = vadd.f32 %v2829_v4, %v964_v2  ;;  %v1221_v8 = vadd.f32 %v2829_v4, %v1220_v3 }
 0x14e   :  { %v2264_v6 = vpack.c.bf16 %v1229_v1, %v1229_v1 }
 0x14f   :  { %1808 = vst.msk [vmem:[%s3474_s3 + $0xfc] sm:$0xf] %vm1744_vm2, %v2200_v5  ;;  %v2198_v9 = vpack.c.bf16 %v965_v7, %v965_v7  ;;  %v2262_v10 = vpack.c.bf16 %v1221_v8, %v1221_v8 }
 0x150   :  { %1872 = vst.msk [vmem:[%s3474_s3 + $0x1fc] sm:$0xf] %vm1744_vm2, %v2264_v6 }
 0x151   :  { %1806 = vst.msk [vmem:[%s3474_s3 + $0xf4] sm:$0xf] %vm1744_vm2, %v2198_v9  ;;  %1870 = vst.msk [vmem:[%s3474_s3 + $0x1f4] sm:$0xf] %vm1744_vm2, %v2262_v10 }

</bundles_post_ra>
